<compile_context>
chip_gen: v6e
topology: v6e:2x2x1
jax: 0.10.0
libtpu: 0.0.40
codegen_flags: <defaults>
</compile_context>

<pallas_src>
import functools
import math

import jax
import jax.numpy as jnp
from jax.experimental import pallas as pl
from jax.experimental.pallas import tpu as pltpu


# ----------------------------------------------------------------------------
# Fused per-(batch, layer) kernel: pre-LN attention + residual, pre-LN GEGLU FF
# + residual.  State (residual stream) is carried in VMEM scratch across the
# depth grid axis.
# ----------------------------------------------------------------------------
def _transformer_layer_kernel(x_ref, g1_ref, wqkv_ref, qs_ref, ks_ref,
                              wo_ref, g2_ref, w1_ref, w2_ref,
                              out_ref, state_ref,
                              *, heads, dim_head, attn_scale):
    layer = pl.program_id(1)
    n_layers = pl.num_programs(1)

    # Load the input residual stream once per batch block.
    @pl.when(layer == 0)
    def _():
        state_ref[...] = x_ref[0].astype(jnp.float32)

    x = state_ref[...]                                  # (n, dim) f32

    def layer_norm(t, gamma):
        mu = jnp.mean(t, axis=-1, keepdims=True)
        c = t - mu
        var = jnp.mean(c * c, axis=-1, keepdims=True)
        return c * jax.lax.rsqrt(var + 1e-5) * gamma    # beta buffer == 0

    def l2norm(t):
        # F.normalize(p=2, dim=-1, eps=1e-12)
        n2 = jnp.sum(t * t, axis=-1, keepdims=True)
        return t * jax.lax.rsqrt(jnp.maximum(n2, 1e-24))

    inner = heads * dim_head

    # ---------------- attention block ----------------
    xn = layer_norm(x, g1_ref[0])                       # (n, dim)
    # Fused Q / K / V projection: one lane-dense (n, 3*inner) MXU matmul.
    qkv = jnp.dot(xn, wqkv_ref[0], preferred_element_type=jnp.float32)
    q = qkv[:, :inner]
    k = qkv[:, inner:2 * inner]
    v = qkv[:, 2 * inner:]

    # Fold the attention logit scale into the q scale (cheaper than scaling sim).
    qs = qs_ref[0] * attn_scale                         # (1, dim_head)
    ks = ks_ref[0]

    head_outs = []
    for h in range(heads):                              # static, unrolled (small head count)
        s = h * dim_head
        qh = l2norm(q[:, s:s + dim_head]) * qs          # (n, d)
        kh = l2norm(k[:, s:s + dim_head]) * ks
        vh = v[:, s:s + dim_head]
        # einsum('i d, j d -> i j') without materialising a transpose
        sim = jax.lax.dot_general(qh, kh, (((1,), (1,)), ((), ())),
                                  preferred_element_type=jnp.float32)
        sim = sim - jnp.max(sim, axis=-1, keepdims=True)
        p = jnp.exp(sim)
        p = p * pl.reciprocal(jnp.sum(p, axis=-1, keepdims=True), approx=True)
        head_outs.append(jnp.dot(p, vh, preferred_element_type=jnp.float32))
    attn_out = jnp.concatenate(head_outs, axis=-1)      # (n, inner)
    x = x + jnp.dot(attn_out, wo_ref[0], preferred_element_type=jnp.float32)

    # ---------------- GEGLU feed-forward block ----------------
    dim_hidden = w2_ref.shape[1]
    xn2 = layer_norm(x, g2_ref[0])
    h12 = jnp.dot(xn2, w1_ref[0], preferred_element_type=jnp.float32)  # (n, 2*dim_hidden)
    val = h12[:, :dim_hidden]
    gate = h12[:, dim_hidden:]
    g = jax.nn.gelu(gate, approximate=True) * val
    x = x + jnp.dot(g, w2_ref[0], preferred_element_type=jnp.float32)

    state_ref[...] = x

    # Write the output block back exactly once (last layer of this batch block).
    @pl.when(layer == n_layers - 1)
    def _():
        out_ref[...] = x[None].astype(out_ref.dtype)


# ----------------------------------------------------------------------------
# Host-side wrapper: one pallas_call for the whole depth-stack
# ----------------------------------------------------------------------------
def transformer_forward(x, params, *, heads, dim_head, attn_scale=8.0):
    B, n, dim = x.shape
    depth = params["wq"].shape[0]

    # Fuse Q and KV projection weights into a single (dim, 3*inner) matrix.
    wqkv = jnp.concatenate([params["wq"], params["wkv"]], axis=-1)

    kernel = functools.partial(_transformer_layer_kernel,
                               heads=heads, dim_head=dim_head,
                               attn_scale=float(attn_scale))

    def w_spec(arr):
        # weight: resident across batch, indexed by layer (depth grid axis)
        return pl.BlockSpec((1,) + arr.shape[1:], lambda b, l: (l, 0, 0))

    io_spec = pl.BlockSpec((1, n, dim), lambda b, l: (b, 0, 0))

    return pl.pallas_call(
        kernel,
        out_shape=jax.ShapeDtypeStruct((B, n, dim), x.dtype),
        grid=(B, depth),
        in_specs=[io_spec,
                  w_spec(params["g_attn"]),
                  w_spec(wqkv),
                  w_spec(params["q_scale"]),
                  w_spec(params["k_scale"]),
                  w_spec(params["wo"]),
                  w_spec(params["g_ff"]),
                  w_spec(params["w_ff1"]),
                  w_spec(params["w_ff2"])],
        out_specs=io_spec,
        scratch_shapes=[pltpu.VMEM((n, dim), jnp.float32)],
        compiler_params=pltpu.CompilerParams(
            dimension_semantics=("parallel", "arbitrary")),
    )(x, params["g_attn"], wqkv, params["q_scale"], params["k_scale"],
      params["wo"], params["g_ff"], params["w_ff1"], params["w_ff2"])


# ----------------------------------------------------------------------------
# Parameter init (weights stored as (in, out), stacked over depth)
# ----------------------------------------------------------------------------
def init_transformer_params(key, dim, depth, dim_head, heads, ff_mult):
    inner = dim_head * heads
    dim_hidden = int(dim * ff_mult * 2 / 3)
    ks = jax.random.split(key, depth * 5 + 4)

    def lin(k, fan_in, fan_out):
        bound = 1.0 / math.sqrt(fan_in)
        return jax.random.uniform(k, (fan_in, fan_out), jnp.float32, -bound, bound)

    wq = jnp.stack([lin(ks[i * 5 + 0], dim, inner) for i in range(depth)])
    wkv = jnp.stack([lin(ks[i * 5 + 1], dim, 2 * inner) for i in range(depth)])
    wo = jnp.stack([lin(ks[i * 5 + 2], inner, dim) for i in range(depth)])
    w_ff1 = jnp.stack([lin(ks[i * 5 + 3], dim, 2 * dim_hidden) for i in range(depth)])
    w_ff2 = jnp.stack([lin(ks[i * 5 + 4], dim_hidden, dim) for i in range(depth)])

    # gammas / qk scales are ones in torch init; perturb slightly so the test
    # actually exercises the broadcasts.
    g_attn = 1.0 + 0.01 * jax.random.normal(ks[-4], (depth, 1, dim), jnp.float32)
    g_ff = 1.0 + 0.01 * jax.random.normal(ks[-3], (depth, 1, dim), jnp.float32)
    q_scale = 1.0 + 0.01 * jax.random.normal(ks[-2], (depth, 1, dim_head), jnp.float32)
    k_scale = 1.0 + 0.01 * jax.random.normal(ks[-1], (depth, 1, dim_head), jnp.float32)

    return dict(wq=wq, wkv=wkv, wo=wo, w_ff1=w_ff1, w_ff2=w_ff2,
                g_attn=g_attn, g_ff=g_ff, q_scale=q_scale, k_scale=k_scale)


# ----------------------------------------------------------------------------
# Pure-JAX reference (same math as the PyTorch module, tanh-gelu)
# ----------------------------------------------------------------------------
def transformer_reference(x, params, *, heads, dim_head, attn_scale=8.0):
    depth = params["wq"].shape[0]
    inner = heads * dim_head
    dim_hidden = params["w_ff2"].shape[1]
    B, n, _ = x.shape

    def layer_norm(t, gamma):
        mu = jnp.mean(t, axis=-1, keepdims=True)
        c = t - mu
        var = jnp.mean(c * c, axis=-1, keepdims=True)
        return c * jax.lax.rsqrt(var + 1e-5) * gamma

    def l2n(t):
        return t * jax.lax.rsqrt(
            jnp.maximum(jnp.sum(t * t, axis=-1, keepdims=True), 1e-24))

    def split_heads(t):
        return t.reshape(B, n, heads, dim_head).transpose(0, 2, 1, 3)

    for l in range(depth):
        xn = layer_norm(x, params["g_attn"][l])
        q = xn @ params["wq"][l]
        kv = xn @ params["wkv"][l]
        k, v = kv[..., :inner], kv[..., inner:]
        q, k, v = split_heads(q), split_heads(k), split_heads(v)
        q = l2n(q) * params["q_scale"][l]
        k = l2n(k) * params["k_scale"][l]
        sim = jnp.einsum('bhid,bhjd->bhij', q, k) * attn_scale
        attn = jax.nn.softmax(sim, axis=-1)
        o = jnp.einsum('bhij,bhjd->bhid', attn, v)
        o = o.transpose(0, 2, 1, 3).reshape(B, n, inner)
        x = x + o @ params["wo"][l]

        xn2 = layer_norm(x, params["g_ff"][l])
        h = xn2 @ params["w_ff1"][l]
        val, gate = h[..., :dim_hidden], h[..., dim_hidden:]
        x = x + (jax.nn.gelu(gate, approximate=True) * val) @ params["w_ff2"][l]
    return x


if __name__ == "__main__":
    key = jax.random.PRNGKey(0)
    k_params, k_x = jax.random.split(key)

    B, n, dim = 2, 8, 32
    depth, heads, dim_head, ff_mult = 2, 4, 16, 4

    params = init_transformer_params(k_params, dim, depth, dim_head, heads, ff_mult)
    x = jax.random.normal(k_x, (B, n, dim), jnp.float32)

    out = transformer_forward(x, params, heads=heads, dim_head=dim_head, attn_scale=8.0)
    out = jax.block_until_ready(out)

    assert out.shape == (B, n, dim)
    assert bool(jnp.all(jnp.isfinite(out)))

    ref = transformer_reference(x, params, heads=heads, dim_head=dim_head, attn_scale=8.0)
    max_err = float(jnp.max(jnp.abs(out - ref)))
    assert max_err < 5e-2, f"max abs err {max_err}"

    print("KERNEL_OK")
</pallas_src>

<mosaic_0001>
module attributes {stable_mosaic.version = 11 : i64} {
  func.func @_transformer_layer_kernel(%arg0: i32, %arg1: i32, %arg2: memref<1x8x32xf32, #tpu.memory_space<vmem>>, %arg3: memref<1x1x32xf32, #tpu.memory_space<vmem>>, %arg4: memref<1x32x192xf32, #tpu.memory_space<vmem>>, %arg5: memref<1x1x16xf32, #tpu.memory_space<vmem>>, %arg6: memref<1x1x16xf32, #tpu.memory_space<vmem>>, %arg7: memref<1x64x32xf32, #tpu.memory_space<vmem>>, %arg8: memref<1x1x32xf32, #tpu.memory_space<vmem>>, %arg9: memref<1x32x170xf32, #tpu.memory_space<vmem>>, %arg10: memref<1x85x32xf32, #tpu.memory_space<vmem>>, %arg11: memref<1x8x32xf32, #tpu.memory_space<vmem>>, %arg12: memref<8x32xf32, #tpu.memory_space<vmem>>) attributes {dimension_semantics = [#tpu.dimension_semantics<parallel>, #tpu.dimension_semantics<arbitrary>], iteration_bounds = array<i64: 2, 2>, scalar_prefetch = 0 : i64, scratch_operands = 1 : i64, tpu.core_type = #tpu.core_type<tc>, window_params = [{transform_indices = @transform_0, window_bounds = array<i64: 1, 8, 32>}, {transform_indices = @transform_1, window_bounds = array<i64: 1, 1, 32>}, {transform_indices = @transform_2, window_bounds = array<i64: 1, 32, 192>}, {transform_indices = @transform_3, window_bounds = array<i64: 1, 1, 16>}, {transform_indices = @transform_4, window_bounds = array<i64: 1, 1, 16>}, {transform_indices = @transform_5, window_bounds = array<i64: 1, 64, 32>}, {transform_indices = @transform_6, window_bounds = array<i64: 1, 1, 32>}, {transform_indices = @transform_7, window_bounds = array<i64: 1, 32, 170>}, {transform_indices = @transform_8, window_bounds = array<i64: 1, 85, 32>}, {transform_indices = @transform_9, window_bounds = array<i64: 1, 8, 32>}]} {
    %c0_i32 = arith.constant 0 : i32
    %0 = arith.cmpi eq, %arg1, %c0_i32 : i32
    %1 = arith.extui %0 : i1 to i32
    %c0_i32_0 = arith.constant 0 : i32
    %2 = arith.cmpi ne, %1, %c0_i32_0 : i32
    scf.if %2 {
      %c0_79 = arith.constant 0 : index
      %c0_80 = arith.constant 0 : index
      %c0_81 = arith.constant 0 : index
      %228 = vector.load %arg2[%c0_79, %c0_80, %c0_81] : memref<1x8x32xf32, #tpu.memory_space<vmem>>, vector<1x8x32xf32>
      %229 = vector.shape_cast %228 : vector<1x8x32xf32> to vector<8x32xf32>
      %c0_82 = arith.constant 0 : index
      %c0_83 = arith.constant 0 : index
      %230 = vector.load %arg12[%c0_82, %c0_83] : memref<8x32xf32, #tpu.memory_space<vmem>>, vector<8x32xf32>
      tpu.vector_store %arg12[%c0_82, %c0_83], %229 {strides = array<i32>} : memref<8x32xf32, #tpu.memory_space<vmem>>, vector<8x32xf32>,
    } else {
    }
    %c0 = arith.constant 0 : index
    %c0_1 = arith.constant 0 : index
    %3 = vector.load %arg12[%c0, %c0_1] : memref<8x32xf32, #tpu.memory_space<vmem>>, vector<8x32xf32>
    %c0_2 = arith.constant 0 : index
    %c0_3 = arith.constant 0 : index
    %c0_4 = arith.constant 0 : index
    %4 = vector.load %arg3[%c0_2, %c0_3, %c0_4] : memref<1x1x32xf32, #tpu.memory_space<vmem>>, vector<1x1x32xf32>
    %5 = vector.shape_cast %4 : vector<1x1x32xf32> to vector<1x32xf32>
    %cst = arith.constant dense<0.000000e+00> : vector<8xf32>
    %6 = vector.multi_reduction <add>, %3, %cst [1] : vector<8x32xf32> to vector<8xf32>
    %7 = vector.shape_cast %6 : vector<8xf32> to vector<8x1xf32>
    %cst_5 = arith.constant 3.200000e+01 : f32
    %8 = vector.broadcast %cst_5 : f32 to vector<8x1xf32>
    %9 = arith.divf %7, %8 : vector<8x1xf32>
    %10 = vector.broadcast %9 : vector<8x1xf32> to vector<8x32xf32>
    %11 = arith.subf %3, %10 : vector<8x32xf32>
    %12 = arith.mulf %11, %11 : vector<8x32xf32>
    %cst_6 = arith.constant dense<0.000000e+00> : vector<8xf32>
    %13 = vector.multi_reduction <add>, %12, %cst_6 [1] : vector<8x32xf32> to vector<8xf32>
    %14 = vector.shape_cast %13 : vector<8xf32> to vector<8x1xf32>
    %cst_7 = arith.constant 3.200000e+01 : f32
    %15 = vector.broadcast %cst_7 : f32 to vector<8x1xf32>
    %16 = arith.divf %14, %15 : vector<8x1xf32>
    %cst_8 = arith.constant 9.99999974E-6 : f32
    %17 = vector.broadcast %cst_8 : f32 to vector<8x1xf32>
    %18 = arith.addf %16, %17 : vector<8x1xf32>
    %19 = math.rsqrt %18 : vector<8x1xf32>
    %20 = vector.broadcast %19 : vector<8x1xf32> to vector<8x32xf32>
    %21 = arith.mulf %11, %20 : vector<8x32xf32>
    %22 = vector.broadcast %5 : vector<1x32xf32> to vector<8x32xf32>
    %23 = arith.mulf %21, %22 : vector<8x32xf32>
    %c0_9 = arith.constant 0 : index
    %c0_10 = arith.constant 0 : index
    %c0_11 = arith.constant 0 : index
    %24 = vector.load %arg4[%c0_9, %c0_10, %c0_11] : memref<1x32x192xf32, #tpu.memory_space<vmem>>, vector<1x32x192xf32>
    %25 = vector.shape_cast %24 : vector<1x32x192xf32> to vector<32x192xf32>
    %cst_12 = arith.constant dense<0.000000e+00> : vector<8x192xf32>
    %26 = tpu.matmul %23, %25, %cst_12 {dimension_numbers = #tpu.dot_dimension_numbers<[1], [0], [0], [1], [0, 0, 1, 1], [], []>} : vector<8x32xf32>, vector<32x192xf32>, vector<8x192xf32> -> vector<8x192xf32>
    %27 = vector.extract_strided_slice %26 {offsets = [0, 0], sizes = [8, 64], strides = [1, 1]} : vector<8x192xf32> to vector<8x64xf32>
    %28 = vector.extract_strided_slice %26 {offsets = [0, 64], sizes = [8, 64], strides = [1, 1]} : vector<8x192xf32> to vector<8x64xf32>
    %29 = vector.extract_strided_slice %26 {offsets = [0, 128], sizes = [8, 64], strides = [1, 1]} : vector<8x192xf32> to vector<8x64xf32>
    %c0_13 = arith.constant 0 : index
    %c0_14 = arith.constant 0 : index
    %c0_15 = arith.constant 0 : index
    %30 = vector.load %arg5[%c0_13, %c0_14, %c0_15] : memref<1x1x16xf32, #tpu.memory_space<vmem>>, vector<1x1x16xf32>
    %31 = vector.shape_cast %30 : vector<1x1x16xf32> to vector<1x16xf32>
    %cst_16 = arith.constant 8.000000e+00 : f32
    %32 = vector.broadcast %cst_16 : f32 to vector<1x16xf32>
    %33 = arith.mulf %31, %32 : vector<1x16xf32>
    %c0_17 = arith.constant 0 : index
    %c0_18 = arith.constant 0 : index
    %c0_19 = arith.constant 0 : index
    %34 = vector.load %arg6[%c0_17, %c0_18, %c0_19] : memref<1x1x16xf32, #tpu.memory_space<vmem>>, vector<1x1x16xf32>
    %35 = vector.shape_cast %34 : vector<1x1x16xf32> to vector<1x16xf32>
    %36 = vector.extract_strided_slice %27 {offsets = [0, 0], sizes = [8, 16], strides = [1, 1]} : vector<8x64xf32> to vector<8x16xf32>
    %37 = arith.mulf %36, %36 : vector<8x16xf32>
    %cst_20 = arith.constant dense<0.000000e+00> : vector<8xf32>
    %38 = vector.multi_reduction <add>, %37, %cst_20 [1] : vector<8x16xf32> to vector<8xf32>
    %39 = vector.shape_cast %38 : vector<8xf32> to vector<8x1xf32>
    %cst_21 = arith.constant 1.000000e-24 : f32
    %40 = vector.broadcast %cst_21 : f32 to vector<8x1xf32>
    %41 = arith.maximumf %39, %40 : vector<8x1xf32>
    %42 = math.rsqrt %41 : vector<8x1xf32>
    %43 = vector.broadcast %42 : vector<8x1xf32> to vector<8x16xf32>
    %44 = arith.mulf %36, %43 : vector<8x16xf32>
    %45 = vector.broadcast %33 : vector<1x16xf32> to vector<8x16xf32>
    %46 = arith.mulf %44, %45 : vector<8x16xf32>
    %47 = vector.extract_strided_slice %28 {offsets = [0, 0], sizes = [8, 16], strides = [1, 1]} : vector<8x64xf32> to vector<8x16xf32>
    %48 = arith.mulf %47, %47 : vector<8x16xf32>
    %cst_22 = arith.constant dense<0.000000e+00> : vector<8xf32>
    %49 = vector.multi_reduction <add>, %48, %cst_22 [1] : vector<8x16xf32> to vector<8xf32>
    %50 = vector.shape_cast %49 : vector<8xf32> to vector<8x1xf32>
    %cst_23 = arith.constant 1.000000e-24 : f32
    %51 = vector.broadcast %cst_23 : f32 to vector<8x1xf32>
    %52 = arith.maximumf %50, %51 : vector<8x1xf32>
    %53 = math.rsqrt %52 : vector<8x1xf32>
    %54 = vector.broadcast %53 : vector<8x1xf32> to vector<8x16xf32>
    %55 = arith.mulf %47, %54 : vector<8x16xf32>
    %56 = vector.broadcast %35 : vector<1x16xf32> to vector<8x16xf32>
    %57 = arith.mulf %55, %56 : vector<8x16xf32>
    %58 = vector.extract_strided_slice %29 {offsets = [0, 0], sizes = [8, 16], strides = [1, 1]} : vector<8x64xf32> to vector<8x16xf32>
    %cst_24 = arith.constant dense<0.000000e+00> : vector<8x8xf32>
    %59 = tpu.matmul %46, %57, %cst_24 {dimension_numbers = #tpu.dot_dimension_numbers<[1], [1], [0], [0], [0, 0, 1, 0], [], []>} : vector<8x16xf32>, vector<8x16xf32>, vector<8x8xf32> -> vector<8x8xf32>
    %cst_25 = arith.constant dense<0xFF800000> : vector<8xf32>
    %60 = vector.multi_reduction <maximumf>, %59, %cst_25 [1] : vector<8x8xf32> to vector<8xf32>
    %61 = vector.shape_cast %60 : vector<8xf32> to vector<8x1xf32>
    %62 = vector.broadcast %61 : vector<8x1xf32> to vector<8x8xf32>
    %63 = arith.subf %59, %62 : vector<8x8xf32>
    %64 = math.exp %63 : vector<8x8xf32>
    %cst_26 = arith.constant dense<0.000000e+00> : vector<8xf32>
    %65 = vector.multi_reduction <add>, %64, %cst_26 [1] : vector<8x8xf32> to vector<8xf32>
    %66 = vector.shape_cast %65 : vector<8xf32> to vector<8x1xf32>
    %67 = tpu.reciprocal %66 {approx = true} : vector<8x1xf32> -> vector<8x1xf32>
    %68 = vector.broadcast %67 : vector<8x1xf32> to vector<8x8xf32>
    %69 = arith.mulf %64, %68 : vector<8x8xf32>
    %cst_27 = arith.constant dense<0.000000e+00> : vector<8x16xf32>
    %70 = tpu.matmul %69, %58, %cst_27 {dimension_numbers = #tpu.dot_dimension_numbers<[1], [0], [0], [1], [0, 0, 1, 1], [], []>} : vector<8x8xf32>, vector<8x16xf32>, vector<8x16xf32> -> vector<8x16xf32>
    %71 = vector.extract_strided_slice %27 {offsets = [0, 16], sizes = [8, 16], strides = [1, 1]} : vector<8x64xf32> to vector<8x16xf32>
    %72 = arith.mulf %71, %71 : vector<8x16xf32>
    %cst_28 = arith.constant dense<0.000000e+00> : vector<8xf32>
    %73 = vector.multi_reduction <add>, %72, %cst_28 [1] : vector<8x16xf32> to vector<8xf32>
    %74 = vector.shape_cast %73 : vector<8xf32> to vector<8x1xf32>
    %cst_29 = arith.constant 1.000000e-24 : f32
    %75 = vector.broadcast %cst_29 : f32 to vector<8x1xf32>
    %76 = arith.maximumf %74, %75 : vector<8x1xf32>
    %77 = math.rsqrt %76 : vector<8x1xf32>
    %78 = vector.broadcast %77 : vector<8x1xf32> to vector<8x16xf32>
    %79 = arith.mulf %71, %78 : vector<8x16xf32>
    %80 = vector.broadcast %33 : vector<1x16xf32> to vector<8x16xf32>
    %81 = arith.mulf %79, %80 : vector<8x16xf32>
    %82 = vector.extract_strided_slice %28 {offsets = [0, 16], sizes = [8, 16], strides = [1, 1]} : vector<8x64xf32> to vector<8x16xf32>
    %83 = arith.mulf %82, %82 : vector<8x16xf32>
    %cst_30 = arith.constant dense<0.000000e+00> : vector<8xf32>
    %84 = vector.multi_reduction <add>, %83, %cst_30 [1] : vector<8x16xf32> to vector<8xf32>
    %85 = vector.shape_cast %84 : vector<8xf32> to vector<8x1xf32>
    %cst_31 = arith.constant 1.000000e-24 : f32
    %86 = vector.broadcast %cst_31 : f32 to vector<8x1xf32>
    %87 = arith.maximumf %85, %86 : vector<8x1xf32>
    %88 = math.rsqrt %87 : vector<8x1xf32>
    %89 = vector.broadcast %88 : vector<8x1xf32> to vector<8x16xf32>
    %90 = arith.mulf %82, %89 : vector<8x16xf32>
    %91 = vector.broadcast %35 : vector<1x16xf32> to vector<8x16xf32>
    %92 = arith.mulf %90, %91 : vector<8x16xf32>
    %93 = vector.extract_strided_slice %29 {offsets = [0, 16], sizes = [8, 16], strides = [1, 1]} : vector<8x64xf32> to vector<8x16xf32>
    %cst_32 = arith.constant dense<0.000000e+00> : vector<8x8xf32>
    %94 = tpu.matmul %81, %92, %cst_32 {dimension_numbers = #tpu.dot_dimension_numbers<[1], [1], [0], [0], [0, 0, 1, 0], [], []>} : vector<8x16xf32>, vector<8x16xf32>, vector<8x8xf32> -> vector<8x8xf32>
    %cst_33 = arith.constant dense<0xFF800000> : vector<8xf32>
    %95 = vector.multi_reduction <maximumf>, %94, %cst_33 [1] : vector<8x8xf32> to vector<8xf32>
    %96 = vector.shape_cast %95 : vector<8xf32> to vector<8x1xf32>
    %97 = vector.broadcast %96 : vector<8x1xf32> to vector<8x8xf32>
    %98 = arith.subf %94, %97 : vector<8x8xf32>
    %99 = math.exp %98 : vector<8x8xf32>
    %cst_34 = arith.constant dense<0.000000e+00> : vector<8xf32>
    %100 = vector.multi_reduction <add>, %99, %cst_34 [1] : vector<8x8xf32> to vector<8xf32>
    %101 = vector.shape_cast %100 : vector<8xf32> to vector<8x1xf32>
    %102 = tpu.reciprocal %101 {approx = true} : vector<8x1xf32> -> vector<8x1xf32>
    %103 = vector.broadcast %102 : vector<8x1xf32> to vector<8x8xf32>
    %104 = arith.mulf %99, %103 : vector<8x8xf32>
    %cst_35 = arith.constant dense<0.000000e+00> : vector<8x16xf32>
    %105 = tpu.matmul %104, %93, %cst_35 {dimension_numbers = #tpu.dot_dimension_numbers<[1], [0], [0], [1], [0, 0, 1, 1], [], []>} : vector<8x8xf32>, vector<8x16xf32>, vector<8x16xf32> -> vector<8x16xf32>
    %106 = vector.extract_strided_slice %27 {offsets = [0, 32], sizes = [8, 16], strides = [1, 1]} : vector<8x64xf32> to vector<8x16xf32>
    %107 = arith.mulf %106, %106 : vector<8x16xf32>
    %cst_36 = arith.constant dense<0.000000e+00> : vector<8xf32>
    %108 = vector.multi_reduction <add>, %107, %cst_36 [1] : vector<8x16xf32> to vector<8xf32>
    %109 = vector.shape_cast %108 : vector<8xf32> to vector<8x1xf32>
    %cst_37 = arith.constant 1.000000e-24 : f32
    %110 = vector.broadcast %cst_37 : f32 to vector<8x1xf32>
    %111 = arith.maximumf %109, %110 : vector<8x1xf32>
    %112 = math.rsqrt %111 : vector<8x1xf32>
    %113 = vector.broadcast %112 : vector<8x1xf32> to vector<8x16xf32>
    %114 = arith.mulf %106, %113 : vector<8x16xf32>
    %115 = vector.broadcast %33 : vector<1x16xf32> to vector<8x16xf32>
    %116 = arith.mulf %114, %115 : vector<8x16xf32>
    %117 = vector.extract_strided_slice %28 {offsets = [0, 32], sizes = [8, 16], strides = [1, 1]} : vector<8x64xf32> to vector<8x16xf32>
    %118 = arith.mulf %117, %117 : vector<8x16xf32>
    %cst_38 = arith.constant dense<0.000000e+00> : vector<8xf32>
    %119 = vector.multi_reduction <add>, %118, %cst_38 [1] : vector<8x16xf32> to vector<8xf32>
    %120 = vector.shape_cast %119 : vector<8xf32> to vector<8x1xf32>
    %cst_39 = arith.constant 1.000000e-24 : f32
    %121 = vector.broadcast %cst_39 : f32 to vector<8x1xf32>
    %122 = arith.maximumf %120, %121 : vector<8x1xf32>
    %123 = math.rsqrt %122 : vector<8x1xf32>
    %124 = vector.broadcast %123 : vector<8x1xf32> to vector<8x16xf32>
    %125 = arith.mulf %117, %124 : vector<8x16xf32>
    %126 = vector.broadcast %35 : vector<1x16xf32> to vector<8x16xf32>
    %127 = arith.mulf %125, %126 : vector<8x16xf32>
    %128 = vector.extract_strided_slice %29 {offsets = [0, 32], sizes = [8, 16], strides = [1, 1]} : vector<8x64xf32> to vector<8x16xf32>
    %cst_40 = arith.constant dense<0.000000e+00> : vector<8x8xf32>
    %129 = tpu.matmul %116, %127, %cst_40 {dimension_numbers = #tpu.dot_dimension_numbers<[1], [1], [0], [0], [0, 0, 1, 0], [], []>} : vector<8x16xf32>, vector<8x16xf32>, vector<8x8xf32> -> vector<8x8xf32>
    %cst_41 = arith.constant dense<0xFF800000> : vector<8xf32>
    %130 = vector.multi_reduction <maximumf>, %129, %cst_41 [1] : vector<8x8xf32> to vector<8xf32>
    %131 = vector.shape_cast %130 : vector<8xf32> to vector<8x1xf32>
    %132 = vector.broadcast %131 : vector<8x1xf32> to vector<8x8xf32>
    %133 = arith.subf %129, %132 : vector<8x8xf32>
    %134 = math.exp %133 : vector<8x8xf32>
    %cst_42 = arith.constant dense<0.000000e+00> : vector<8xf32>
    %135 = vector.multi_reduction <add>, %134, %cst_42 [1] : vector<8x8xf32> to vector<8xf32>
    %136 = vector.shape_cast %135 : vector<8xf32> to vector<8x1xf32>
    %137 = tpu.reciprocal %136 {approx = true} : vector<8x1xf32> -> vector<8x1xf32>
    %138 = vector.broadcast %137 : vector<8x1xf32> to vector<8x8xf32>
    %139 = arith.mulf %134, %138 : vector<8x8xf32>
    %cst_43 = arith.constant dense<0.000000e+00> : vector<8x16xf32>
    %140 = tpu.matmul %139, %128, %cst_43 {dimension_numbers = #tpu.dot_dimension_numbers<[1], [0], [0], [1], [0, 0, 1, 1], [], []>} : vector<8x8xf32>, vector<8x16xf32>, vector<8x16xf32> -> vector<8x16xf32>
    %141 = vector.extract_strided_slice %27 {offsets = [0, 48], sizes = [8, 16], strides = [1, 1]} : vector<8x64xf32> to vector<8x16xf32>
    %142 = arith.mulf %141, %141 : vector<8x16xf32>
    %cst_44 = arith.constant dense<0.000000e+00> : vector<8xf32>
    %143 = vector.multi_reduction <add>, %142, %cst_44 [1] : vector<8x16xf32> to vector<8xf32>
    %144 = vector.shape_cast %143 : vector<8xf32> to vector<8x1xf32>
    %cst_45 = arith.constant 1.000000e-24 : f32
    %145 = vector.broadcast %cst_45 : f32 to vector<8x1xf32>
    %146 = arith.maximumf %144, %145 : vector<8x1xf32>
    %147 = math.rsqrt %146 : vector<8x1xf32>
    %148 = vector.broadcast %147 : vector<8x1xf32> to vector<8x16xf32>
    %149 = arith.mulf %141, %148 : vector<8x16xf32>
    %150 = vector.broadcast %33 : vector<1x16xf32> to vector<8x16xf32>
    %151 = arith.mulf %149, %150 : vector<8x16xf32>
    %152 = vector.extract_strided_slice %28 {offsets = [0, 48], sizes = [8, 16], strides = [1, 1]} : vector<8x64xf32> to vector<8x16xf32>
    %153 = arith.mulf %152, %152 : vector<8x16xf32>
    %cst_46 = arith.constant dense<0.000000e+00> : vector<8xf32>
    %154 = vector.multi_reduction <add>, %153, %cst_46 [1] : vector<8x16xf32> to vector<8xf32>
    %155 = vector.shape_cast %154 : vector<8xf32> to vector<8x1xf32>
    %cst_47 = arith.constant 1.000000e-24 : f32
    %156 = vector.broadcast %cst_47 : f32 to vector<8x1xf32>
    %157 = arith.maximumf %155, %156 : vector<8x1xf32>
    %158 = math.rsqrt %157 : vector<8x1xf32>
    %159 = vector.broadcast %158 : vector<8x1xf32> to vector<8x16xf32>
    %160 = arith.mulf %152, %159 : vector<8x16xf32>
    %161 = vector.broadcast %35 : vector<1x16xf32> to vector<8x16xf32>
    %162 = arith.mulf %160, %161 : vector<8x16xf32>
    %163 = vector.extract_strided_slice %29 {offsets = [0, 48], sizes = [8, 16], strides = [1, 1]} : vector<8x64xf32> to vector<8x16xf32>
    %cst_48 = arith.constant dense<0.000000e+00> : vector<8x8xf32>
    %164 = tpu.matmul %151, %162, %cst_48 {dimension_numbers = #tpu.dot_dimension_numbers<[1], [1], [0], [0], [0, 0, 1, 0], [], []>} : vector<8x16xf32>, vector<8x16xf32>, vector<8x8xf32> -> vector<8x8xf32>
    %cst_49 = arith.constant dense<0xFF800000> : vector<8xf32>
    %165 = vector.multi_reduction <maximumf>, %164, %cst_49 [1] : vector<8x8xf32> to vector<8xf32>
    %166 = vector.shape_cast %165 : vector<8xf32> to vector<8x1xf32>
    %167 = vector.broadcast %166 : vector<8x1xf32> to vector<8x8xf32>
    %168 = arith.subf %164, %167 : vector<8x8xf32>
    %169 = math.exp %168 : vector<8x8xf32>
    %cst_50 = arith.constant dense<0.000000e+00> : vector<8xf32>
    %170 = vector.multi_reduction <add>, %169, %cst_50 [1] : vector<8x8xf32> to vector<8xf32>
    %171 = vector.shape_cast %170 : vector<8xf32> to vector<8x1xf32>
    %172 = tpu.reciprocal %171 {approx = true} : vector<8x1xf32> -> vector<8x1xf32>
    %173 = vector.broadcast %172 : vector<8x1xf32> to vector<8x8xf32>
    %174 = arith.mulf %169, %173 : vector<8x8xf32>
    %cst_51 = arith.constant dense<0.000000e+00> : vector<8x16xf32>
    %175 = tpu.matmul %174, %163, %cst_51 {dimension_numbers = #tpu.dot_dimension_numbers<[1], [0], [0], [1], [0, 0, 1, 1], [], []>} : vector<8x8xf32>, vector<8x16xf32>, vector<8x16xf32> -> vector<8x16xf32>
    %176 = tpu.concatenate %70, %105, %140, %175 in 1 : vector<8x16xf32>, vector<8x16xf32>, vector<8x16xf32>, vector<8x16xf32> -> vector<8x64xf32>
    %c0_52 = arith.constant 0 : index
    %c0_53 = arith.constant 0 : index
    %c0_54 = arith.constant 0 : index
    %177 = vector.load %arg7[%c0_52, %c0_53, %c0_54] : memref<1x64x32xf32, #tpu.memory_space<vmem>>, vector<1x64x32xf32>
    %178 = vector.shape_cast %177 : vector<1x64x32xf32> to vector<64x32xf32>
    %cst_55 = arith.constant dense<0.000000e+00> : vector<8x32xf32>
    %179 = tpu.matmul %176, %178, %cst_55 {dimension_numbers = #tpu.dot_dimension_numbers<[1], [0], [0], [1], [0, 0, 1, 1], [], []>} : vector<8x64xf32>, vector<64x32xf32>, vector<8x32xf32> -> vector<8x32xf32>
    %180 = arith.addf %3, %179 : vector<8x32xf32>
    %c0_56 = arith.constant 0 : index
    %c0_57 = arith.constant 0 : index
    %c0_58 = arith.constant 0 : index
    %181 = vector.load %arg8[%c0_56, %c0_57, %c0_58] : memref<1x1x32xf32, #tpu.memory_space<vmem>>, vector<1x1x32xf32>
    %182 = vector.shape_cast %181 : vector<1x1x32xf32> to vector<1x32xf32>
    %cst_59 = arith.constant dense<0.000000e+00> : vector<8xf32>
    %183 = vector.multi_reduction <add>, %180, %cst_59 [1] : vector<8x32xf32> to vector<8xf32>
    %184 = vector.shape_cast %183 : vector<8xf32> to vector<8x1xf32>
    %cst_60 = arith.constant 3.200000e+01 : f32
    %185 = vector.broadcast %cst_60 : f32 to vector<8x1xf32>
    %186 = arith.divf %184, %185 : vector<8x1xf32>
    %187 = vector.broadcast %186 : vector<8x1xf32> to vector<8x32xf32>
    %188 = arith.subf %180, %187 : vector<8x32xf32>
    %189 = arith.mulf %188, %188 : vector<8x32xf32>
    %cst_61 = arith.constant dense<0.000000e+00> : vector<8xf32>
    %190 = vector.multi_reduction <add>, %189, %cst_61 [1] : vector<8x32xf32> to vector<8xf32>
    %191 = vector.shape_cast %190 : vector<8xf32> to vector<8x1xf32>
    %cst_62 = arith.constant 3.200000e+01 : f32
    %192 = vector.broadcast %cst_62 : f32 to vector<8x1xf32>
    %193 = arith.divf %191, %192 : vector<8x1xf32>
    %cst_63 = arith.constant 9.99999974E-6 : f32
    %194 = vector.broadcast %cst_63 : f32 to vector<8x1xf32>
    %195 = arith.addf %193, %194 : vector<8x1xf32>
    %196 = math.rsqrt %195 : vector<8x1xf32>
    %197 = vector.broadcast %196 : vector<8x1xf32> to vector<8x32xf32>
    %198 = arith.mulf %188, %197 : vector<8x32xf32>
    %199 = vector.broadcast %182 : vector<1x32xf32> to vector<8x32xf32>
    %200 = arith.mulf %198, %199 : vector<8x32xf32>
    %c0_64 = arith.constant 0 : index
    %c0_65 = arith.constant 0 : index
    %c0_66 = arith.constant 0 : index
    %201 = vector.load %arg9[%c0_64, %c0_65, %c0_66] : memref<1x32x170xf32, #tpu.memory_space<vmem>>, vector<1x32x170xf32>
    %202 = vector.shape_cast %201 : vector<1x32x170xf32> to vector<32x170xf32>
    %cst_67 = arith.constant dense<0.000000e+00> : vector<8x170xf32>
    %203 = tpu.matmul %200, %202, %cst_67 {dimension_numbers = #tpu.dot_dimension_numbers<[1], [0], [0], [1], [0, 0, 1, 1], [], []>} : vector<8x32xf32>, vector<32x170xf32>, vector<8x170xf32> -> vector<8x170xf32>
    %204 = vector.extract_strided_slice %203 {offsets = [0, 0], sizes = [8, 85], strides = [1, 1]} : vector<8x170xf32> to vector<8x85xf32>
    %205 = vector.extract_strided_slice %203 {offsets = [0, 85], sizes = [8, 85], strides = [1, 1]} : vector<8x170xf32> to vector<8x85xf32>
    %206 = arith.mulf %205, %205 : vector<8x85xf32>
    %207 = arith.mulf %205, %206 : vector<8x85xf32>
    %cst_68 = arith.constant 4.471500e-02 : f32
    %208 = vector.broadcast %cst_68 : f32 to vector<8x85xf32>
    %209 = arith.mulf %208, %207 : vector<8x85xf32>
    %210 = arith.addf %205, %209 : vector<8x85xf32>
    %cst_69 = arith.constant 0.797884583 : f32
    %211 = vector.broadcast %cst_69 : f32 to vector<8x85xf32>
    %212 = arith.mulf %211, %210 : vector<8x85xf32>
    %213 = math.tanh %212 : vector<8x85xf32>
    %cst_70 = arith.constant 1.000000e+00 : f32
    %214 = vector.broadcast %cst_70 : f32 to vector<8x85xf32>
    %215 = arith.addf %214, %213 : vector<8x85xf32>
    %cst_71 = arith.constant 5.000000e-01 : f32
    %216 = vector.broadcast %cst_71 : f32 to vector<8x85xf32>
    %217 = arith.mulf %216, %215 : vector<8x85xf32>
    %218 = arith.mulf %205, %217 : vector<8x85xf32>
    %219 = arith.mulf %218, %204 : vector<8x85xf32>
    %c0_72 = arith.constant 0 : index
    %c0_73 = arith.constant 0 : index
    %c0_74 = arith.constant 0 : index
    %220 = vector.load %arg10[%c0_72, %c0_73, %c0_74] : memref<1x85x32xf32, #tpu.memory_space<vmem>>, vector<1x85x32xf32>
    %221 = vector.shape_cast %220 : vector<1x85x32xf32> to vector<85x32xf32>
    %cst_75 = arith.constant dense<0.000000e+00> : vector<8x32xf32>
    %222 = tpu.matmul %219, %221, %cst_75 {dimension_numbers = #tpu.dot_dimension_numbers<[1], [0], [0], [1], [0, 0, 1, 1], [], []>} : vector<8x85xf32>, vector<85x32xf32>, vector<8x32xf32> -> vector<8x32xf32>
    %223 = arith.addf %180, %222 : vector<8x32xf32>
    %c0_76 = arith.constant 0 : index
    %c0_77 = arith.constant 0 : index
    %224 = vector.load %arg12[%c0_76, %c0_77] : memref<8x32xf32, #tpu.memory_space<vmem>>, vector<8x32xf32>
    tpu.vector_store %arg12[%c0_76, %c0_77], %223 {strides = array<i32>} : memref<8x32xf32, #tpu.memory_space<vmem>>, vector<8x32xf32>,
    %c1_i32 = arith.constant 1 : i32
    %225 = arith.cmpi eq, %arg1, %c1_i32 : i32
    %226 = arith.extui %225 : i1 to i32
    %c0_i32_78 = arith.constant 0 : i32
    %227 = arith.cmpi ne, %226, %c0_i32_78 : i32
    scf.if %227 {
      %228 = vector.shape_cast %223 : vector<8x32xf32> to vector<1x8x32xf32>
      %c0_79 = arith.constant 0 : index
      %c0_80 = arith.constant 0 : index
      %c0_81 = arith.constant 0 : index
      %229 = vector.load %arg11[%c0_79, %c0_80, %c0_81] : memref<1x8x32xf32, #tpu.memory_space<vmem>>, vector<1x8x32xf32>
      tpu.vector_store %arg11[%c0_79, %c0_80, %c0_81], %228 {strides = array<i32>} : memref<1x8x32xf32, #tpu.memory_space<vmem>>, vector<1x8x32xf32>,
    } else {
    }
    return
  }
  func.func @transform_0(%arg0: i32, %arg1: i32) -> (i32, i32, i32) {
    %c0_i32 = arith.constant 0 : i32
    %c0_i32_0 = arith.constant 0 : i32
    %c0_i32_1 = arith.constant 0 : i32
    return %arg0, %c0_i32, %c0_i32_0 : i32, i32, i32
  }
  func.func @transform_1(%arg0: i32, %arg1: i32) -> (i32, i32, i32) {
    %c0_i32 = arith.constant 0 : i32
    %c0_i32_0 = arith.constant 0 : i32
    %c0_i32_1 = arith.constant 0 : i32
    return %arg1, %c0_i32, %c0_i32_0 : i32, i32, i32
  }
  func.func @transform_2(%arg0: i32, %arg1: i32) -> (i32, i32, i32) {
    %c0_i32 = arith.constant 0 : i32
    %c0_i32_0 = arith.constant 0 : i32
    %c0_i32_1 = arith.constant 0 : i32
    return %arg1, %c0_i32, %c0_i32_0 : i32, i32, i32
  }
  func.func @transform_3(%arg0: i32, %arg1: i32) -> (i32, i32, i32) {
    %c0_i32 = arith.constant 0 : i32
    %c0_i32_0 = arith.constant 0 : i32
    %c0_i32_1 = arith.constant 0 : i32
    return %arg1, %c0_i32, %c0_i32_0 : i32, i32, i32
  }
  func.func @transform_4(%arg0: i32, %arg1: i32) -> (i32, i32, i32) {
    %c0_i32 = arith.constant 0 : i32
    %c0_i32_0 = arith.constant 0 : i32
    %c0_i32_1 = arith.constant 0 : i32
    return %arg1, %c0_i32, %c0_i32_0 : i32, i32, i32
  }
  func.func @transform_5(%arg0: i32, %arg1: i32) -> (i32, i32, i32) {
    %c0_i32 = arith.constant 0 : i32
    %c0_i32_0 = arith.constant 0 : i32
    %c0_i32_1 = arith.constant 0 : i32
    return %arg1, %c0_i32, %c0_i32_0 : i32, i32, i32
  }
  func.func @transform_6(%arg0: i32, %arg1: i32) -> (i32, i32, i32) {
    %c0_i32 = arith.constant 0 : i32
    %c0_i32_0 = arith.constant 0 : i32
    %c0_i32_1 = arith.constant 0 : i32
    return %arg1, %c0_i32, %c0_i32_0 : i32, i32, i32
  }
  func.func @transform_7(%arg0: i32, %arg1: i32) -> (i32, i32, i32) {
    %c0_i32 = arith.constant 0 : i32
    %c0_i32_0 = arith.constant 0 : i32
    %c0_i32_1 = arith.constant 0 : i32
    return %arg1, %c0_i32, %c0_i32_0 : i32, i32, i32
  }
  func.func @transform_8(%arg0: i32, %arg1: i32) -> (i32, i32, i32) {
    %c0_i32 = arith.constant 0 : i32
    %c0_i32_0 = arith.constant 0 : i32
    %c0_i32_1 = arith.constant 0 : i32
    return %arg1, %c0_i32, %c0_i32_0 : i32, i32, i32
  }
  func.func @transform_9(%arg0: i32, %arg1: i32) -> (i32, i32, i32) {
    %c0_i32 = arith.constant 0 : i32
    %c0_i32_0 = arith.constant 0 : i32
    %c0_i32_1 = arith.constant 0 : i32
    return %arg0, %c0_i32, %c0_i32_0 : i32, i32, i32
  }
}

</mosaic_0001>

<bundles_post_ra>
// kernel: tpu_custom_call.1
= control target key start
LH: loop header
LB: loop body
LE: loop exit
PB: predicated region body
PF: predicated region fallthrough
CT: control target
= control target key end

     0   :  { %s2686_s0 = inlined_call_operand.vmem [shape: f32[2,8,32], index: 0, kind: input, shape index: {}]   ;;  %s2687_s1 = inlined_call_operand.vmem [shape: f32[2,1,32], index: 1, kind: input, shape index: {}]   ;;  %s2688_s2 = inlined_call_operand.vmem [shape: f32[2,32,192], index: 2, kind: input, shape index: {}]   ;;  %s2689_s3 = inlined_call_operand.vmem [shape: f32[2,1,16], index: 3, kind: input, shape index: {}]   ;;  %s2690_s4 = inlined_call_operand.vmem [shape: f32[2,1,16], index: 4, kind: input, shape index: {}]   ;;  %s2691_s5 = inlined_call_operand.vmem [shape: f32[2,64,32], index: 5, kind: input, shape index: {}]   ;;  %s2692_s6 = inlined_call_operand.vmem [shape: f32[2,1,32], index: 6, kind: input, shape index: {}]   ;;  %s2693_s7 = inlined_call_operand.vmem [shape: f32[2,32,170], index: 7, kind: input, shape index: {}]   ;;  %s2694_s8 = inlined_call_operand.vmem [shape: f32[2,85,32], index: 8, kind: input, shape index: {}]   ;;  %s2695_s9 = inlined_call_operand.hbm [shape: f32[2,8,32], index: 9, kind: output, shape index: {}]  }
   0x1   :  { %2708 = sst [smem:[#allocation16_spill]] %s2686_s0 }
   0x2   :  { %2709 = sst [smem:[#allocation17_spill]] %s2695_s9 }
   0x3   :  { %14 = vsyncpa [#allocation4], 0 }
   0x4   :  { %16 = vsyncpa [#allocation4 + $0x1], 0  ;;  %s2309_s30 = smov 0   ;;  %s2311_s10 = smov 0  }
   0x5   :  { %s2313_s11 = smov 0   ;;  %s2315_s12 = smov 0  }
   0x6   :  { %s2317_s13 = smov 0   ;;  %s2319_s14 = smov 0  }
   0x7   :  { %s2321_s15 = smov 0   ;;  %s2323_s16 = smov 0  }
   0x8 LB: > { %2710 = sst [smem:[#allocation6_spill]] %s2217_s30  ;;  %s1866_s17 = sadd.s32 4294967295, %s2245_s16   ;;  %s2245_s16 = sphi %s2323_s16, %s22_s16   ;;  %s2241_s15 = sphi %s2321_s15, %s2736_s15   ;;  %s2237_s14 = sphi %s2319_s14, %s2735_s14   ;;  %s2233_s13 = sphi %s2317_s13, %s2734_s13   ;;  %s2229_s12 = sphi %s2315_s12, %s2733_s12   ;;  %s2225_s11 = sphi %s2313_s11, %s2732_s11   ;;  %s2221_s10 = sphi %s2311_s10, %s2738_s10   ;;  %s2217_s30 = sphi %s2309_s30, %s2737_s30  }
   0x9   : > { %2711 = sst [smem:[#allocation7_spill]] %s2225_s11  ;;  %s1867_s18 = sadd.s32 4294967294, %s2245_s16  }
   0xa   : > { %2712 = sst [smem:[#allocation8_spill]] %s2237_s14  ;;  %s31_s19 = sadd.s32 1, %s2237_s14 }
   0xb   : > { %2713 = sst [smem:[#allocation9_spill]] %s2241_s15  ;;  %p32_p0 = scmp.ge.s32.totalorder %s31_s19, 2 }
   0xc   : > { %2714 = sst [smem:[#allocation10_spill]] %s2245_s16  ;;  %s34_s20 = sadd.s32 1, %s2241_s15 }
   0xd   : > { %p285_p1 = scmp.ne.s32.totalorder %s2225_s11, %s2221_s10  ;;  %p286_p2 = scmp.eq.s32.totalorder %s1866_s17, 3 }
   0xe   : > { %s2740_s19 = smov (%p32_p0, %s31_s19), 0  ;;  %s2742_s20 = smov (!%p32_p0, %s34_s20), %s2241_s15 }
   0xf   : > { %2715 = sst [smem:[#allocation11_spill]] %s2740_s19  ;;  %p2358_p3 = por %p286_p2, %p285_p1 }
  0x10   : > { %p291_p4 = scmp.ne.s32.totalorder %s2221_s10, %s2217_s30  ;;  %p36_p5 = scmp.ge.s32.totalorder %s2742_s20, 2 }
  0x11   : > { %s2716_s21 = scalar_select %p2358_p3, 1, 0 }
  0x12   : > { %p292_p6 = scmp.eq.s32.totalorder %s1867_s18, 3  ;;  %p1870_p7 = scmp.ge.s32.totalorder %s2245_s16, 1 }
  0x13   : > { %2717 = sst [smem:[#allocation12_spill]] %s2716_s21  ;;  %p373_p8 = scmp.lt.s32.totalorder %s2245_s16, 5 }
  0x14   : > { %s2744_s20 = smov (%p36_p5, %s2742_s20), 0  ;;  %p2368_p9 = por %p292_p6, %p291_p4 }
  0x15   : > { %2718 = sst [smem:[#allocation13_spill]] %s2744_s20  ;;  %p374_p10 = pnand %p1870_p7, %p373_p8 }
  0x16   : > { %s2719_s22 = scalar_select %p2368_p9, 1, 0 }
  0x17   : > { %s272_s23 = ssub.s32 %s2241_s15, %s2744_s20  ;;  %s275_s24 = sadd.s32 1, %s2225_s11 }
  0x18   : > { %2720 = sst [smem:[#allocation14_spill]] %s2719_s22  ;;  %p273_p11 = scmp.eq.s32.totalorder %s272_s23, 0 }
  0x19   : > { %377 = sbr.rel (%p374_p10) target bundleno = 2928 (0xb70), region = 56  ;;  %s2697_s26 = sand.u32 (!%p374_p10), 1, %s2221_s10  }
  0x1a   : > { %s2376_s25 = scalar_select %p273_p11, %s2225_s11, %s275_s24  }
  0x1b   : > { %p440_p12 = scmp.lt.s32.totalorder (!%p374_p10), %s2233_s13, 1  ;;  %s2382_s27 = sshll.u32 (!%p374_p10), %s2697_s26, 3 }
  0x1c   : > { %2721 = sst [smem:[#allocation15_spill]] %s2376_s25  ;;  %p444_p13 = scmp.lt.s32.totalorder (!%p374_p10), %s2229_s12, 1 }
  0x1d   : > { %s2722_s0 = sld [smem:[#allocation16_spill]] (!%p374_p10)  ;;  %p1880_p0 = scmp.ne.s32.totalorder (!%p374_p10), %s2229_s12, 0 }
  0x1e   : > { %s441_s28 = scalar_select %p440_p12, %s2233_s13, 1 }
  0x1f   : > { %s2387_s29 = scalar_select %p444_p13, %s2229_s12, 1 }
  0x20   : > { %s1872_s17 = sshll.u32 %s441_s28, 3  ;;  %s439_s28 = scalar_lea.vmem [#allocation3], %s2382_s27 }
  0x21   : > { %s1906_s15 = sshll.u32 %s2387_s29, 6  ;;  %s457_s21 = scalar_lea.vmem %s2690_s4, %s2387_s29 }
  0x22   : > { %s2404_s16 = scalar_lea.vmem %s2688_s2, %s1906_s15  ;;  %s2413_s23 = scalar_lea.vmem %s2691_s5, %s1906_s15 }
  0x23   : > { %s443_s24 = scalar_lea.vmem %s2722_s0, %s1872_s17  ;;  %s465_s26 = scalar_lea.vmem %s2692_s6, %s2387_s29 }
  0x24   : > { %s2422_s11 = scalar_lea.vmem %s2693_s7, %s1906_s15  ;;  %s2030_s30 = smul.u32 88, %s2387_s29 }
  0x25   : > { %479 = sbr.rel (%p1880_p0) target bundleno = 44 (0x2c), region = 60 }
  0x26   : > { %s2428_s9 = scalar_lea.vmem %s2694_s8, %s2030_s30 }
  0x2a   : > { %v480_v0 = vld [vmem:[%s443_s24] sm:$0xff]  ;;  %vm481_vm0 = vcmask 261120  }
  0x2b   : > { %482 = vst.msk [vmem:[#allocation2] sm:$0xff] %vm481_vm0, %v480_v0 }
  0x2c PF: > { %vm485_vm1 = vcmask 261120   ;;  %v514_v8 = vld [vmem:[%s2404_s16 + $0x38] sm:$0xff]  ;;  %v513_v9 = vld [vmem:[%s2404_s16 + $0x30] sm:$0xff]  ;;  %v512_v10 = vld [vmem:[%s2404_s16 + $0x28] sm:$0xff]  ;;  %v2247_v12 = vmov 0.0   ;;  %s2723_s24 = scalar_lea.vmem %s2687_s1, %s2387_s29  ;;  %s2249_s18 = smov 64   ;;  %v601_v28 = vlaneseq }
  0x2d   : > { %542 = vmatprep.subr.mxu0 %v514_v8  ;;  %v511_v11 = vld [vmem:[%s2404_s16 + $0x20] sm:$0xff]  ;;  %582 = vmatprep.mubr.f32.mxu0 %v2247_v12  ;;  %v510_v13 = vld [vmem:[%s2404_s16 + $0x18] sm:$0xff]  ;;  %v509_v14 = vld [vmem:[%s2404_s16 + $0x10] sm:$0xff]  ;;  %s2250_s20 = smov 48   ;;  %s2251_s14 = smov 32   ;;  %vm593_vm2 = vcmask 130048  }
  0x2e   : > { %543 = vmatpush1.msra.mxu0 %v513_v9  ;;  %1951 = vmatprep.subr.mxu1 %v2247_v12  ;;  %v508_v15 = vld [vmem:[%s2404_s16 + $0x8] sm:$0xff]  ;;  %v507_v16 = vld [vmem:[%s2404_s16] sm:$0xff]  ;;  %s2248_s16 = smov 112   ;;  %s2252_s25 = smov 96   ;;  %v602_v29 = vshrl.u32 %v601_v28, 7  ;;  %vm2255_vm3 = vmmov 0  }
  0x2f   : > { %544 = vmatprep.subr.mxu0 %v512_v10  ;;  %v1881_v21 = vld [vmem:[%s2723_s24] ss:$0 sm:$0xff]  ;;  %s2253_s30 = smov 16   ;;  %s2724_s0 = scalar_lea.vmem %s2689_s3, %s2387_s29  ;;  %1953 = vmatprep.mubr.msk.f32.mxu1 %vm2255_vm3, %v2247_v12  ;;  %vm704_vm4 = vcmask 64512   ;;  %vm1383_vm5 = vcmask 392192   ;;  %vm1393_vm6 = vcmask 523264  }
  0x30   : > { %545 = vmatpush1.msra.mxu0 %v511_v11  ;;  %v1883_v27 = vld [vmem:[%s457_s21] ss:$0 sm:$0xff]  ;;  %s2254_s15 = smov 80   ;;  %v603_v32 = vsub.s32 0, %v602_v29  ;;  %vm1617_vm7 = vcmask 1044480   ;;  %vm1612_vm8 = vcmask 351232  }
  0x31   : > { %546 = vmatprep.subr.mxu0 %v510_v13  ;;  %v589_v30 = vld [vmem:[%s2724_s0] sm:$0x1]  ;;  %vm1614_vm9 = vcmask 695296   ;;  %p1901_p1 = scmp.ne.s32.totalorder %s2229_s12, 1 }
  0x32   : > { %v2432_v1 = vld [vmem:[#allocation2] sm:$0xff]  ;;  %547 = vmatpush1.msra.mxu0 %v509_v14  ;;  %v590_v31 = vmul.f32 8.0, %v589_v30 }
  0x33   : > { %v486_v2 = vsel %vm485_vm1, %v2432_v1, 0.0  ;;  %548 = vmatprep.subr.mxu0 %v508_v15 }
  0x34   : > { %487 = vadd.xlane.f32.xlu0 %v486_v2  ;;  %549 = vmatpush1.msra.mxu0 %v507_v16  ;;  %v2483_v33 = vrot.slane %v590_v31, %v603_v32 }
  0x35   : > { %1946 = vmatprep.subr.mxu0 %v2247_v12 }
  0xbd   : > { %v488_v3 = vpop.xlane.xlu0 %487 }
  0xbe   : > { %v490_v4 = vmul.f32 0.03125, %v488_v3 }
  0xc0   : > { %v491_v5 = vsub.f32 %v2432_v1, %v490_v4 }
  0xc2   : > { %v492_v6 = vmul.f32 %v491_v5, %v491_v5 }
  0xc4   : > { %v493_v7 = vsel %vm485_vm1, %v492_v6, 0.0 }
  0xc5   : > { %494 = vadd.xlane.f32.xlu0 %v493_v7 }
 0x14e   : > { %v495_v17 = vpop.xlane.xlu0 %494 }
 0x14f   : > { %v496_v18 = vmul.f32 0.03125, %v495_v17 }
 0x151   : > { %v497_v19 = vadd.f32 1e-05, %v496_v18 }
 0x153   : > { %2113 = vrsqrt.f32 %v497_v19 }
 0x160   : > { %v2114_v20 = vpop.eup %2113 }
 0x161   : > { %v499_v22 = vmul.f32 %v2114_v20, %v491_v5 }
 0x163   : > { %v506_v23 = vmul.f32 %v1881_v21, %v499_v22 }
 0x165   : > { %1882 = vmatmul.mubr.msk.f32.vlgmr.msra.gmra.mxu0 %vm485_vm1, %v506_v23 }
 0x166   : > { %1948 = vmatprep.mubr.msk.f32.mxu0 %vm2255_vm3, %v2247_v12 }
 0x225   : > { %v2455_v24 = vpop.f32.mrf.mxu0 }
 0x226   : > { %v592_v25 = vmul.f32 %v2455_v24, %v2455_v24 }
 0x227   : > { %v2459_v26 = vpop.f32.mrf.mxu0 }
 0x228   : > { %789 = vrot.lane.b32.xlu0 %v592_v25, %s2248_s16  ;;  %608 = vrot.lane.b32.xlu1 %v592_v25, %s2249_s18  ;;  %v594_v48 = vsel %vm593_vm2, %v592_v25, 0.0 }
 0x229   : > { %1952 = vmatpush3.msra.mxu1 %v2459_v26 }
 0x22a   : > { %1961 = vmatprep.subr.mxu1 %v2247_v12 }
 0x22c   : > { %802 = vrot.lane.b32.xlu1 %v592_v25, %s2250_s20  ;;  %622 = vrot.lane.b32.xlu0 %v1883_v27, %s2249_s18 }
 0x230   : > { %996 = vrot.lane.b32.xlu1 %v592_v25, %s2251_s14  ;;  %1005 = vrot.lane.b32.xlu0 %v1883_v27, %s2252_s25 }
 0x234   : > { %983 = vrot.lane.b32.xlu1 %v592_v25, %s2252_s25 }
 0x238   : > { %1189 = vrot.lane.b32.xlu1 %v592_v25, %s2253_s30 }
 0x23c   : > { %1176 = vrot.lane.b32.xlu1 %v592_v25, %s2254_s15 }
 0x240   : > { %811 = vrot.lane.b32.xlu1 %v1883_v27, %s2254_s15 }
 0x244   : > { %798 = vrot.lane.b32.xlu1 %v2483_v33, %s2253_s30 }
 0x248   : > { %992 = vrot.lane.b32.xlu1 %v2483_v33, %s2251_s14 }
 0x29a   : > { %v609_v34 = vpop.permute.xlu1 %608  ;;  %v790_v36 = vpop.permute.xlu0 %789 }
 0x29b   : > { %v611_v35 = vsel %vm593_vm2, %v609_v34, 0.0  ;;  %v792_v38 = vsel %vm593_vm2, %v790_v36, 0.0 }
 0x29c   : > { %612 = vadd.xlane.f32.xlu1 %v611_v35 }
 0x29e   : > { %v803_v37 = vpop.permute.xlu1 %802  ;;  %v623_v51 = vpop.permute.xlu0 %622 }
 0x29f   : > { %v805_v39 = vsel %vm593_vm2, %v803_v37, 0.0 }
 0x2a0   : > { %793 = vadd.xlane.f32.xlu1 %v792_v38  ;;  %806 = vadd.xlane.f32.xlu0 %v805_v39 }
 0x2a2   : > { %v997_v40 = vpop.permute.xlu1 %996  ;;  %v1006_v53 = vpop.permute.xlu0 %1005 }
 0x2a3   : > { %v999_v41 = vsel %vm593_vm2, %v997_v40, 0.0 }
 0x2a4   : > { %1000 = vadd.xlane.f32.xlu0 %v999_v41 }
 0x2a6   : > { %v984_v42 = vpop.permute.xlu1 %983 }
 0x2a7   : > { %v986_v43 = vsel %vm593_vm2, %v984_v42, 0.0 }
 0x2a8   : > { %987 = vadd.xlane.f32.xlu1 %v986_v43 }
 0x2aa   : > { %v1190_v44 = vpop.permute.xlu1 %1189 }
 0x2ab   : > { %v1192_v45 = vsel %vm593_vm2, %v1190_v44, 0.0 }
 0x2ac   : > { %1193 = vadd.xlane.f32.xlu0 %v1192_v45 }
 0x2ae   : > { %v1177_v46 = vpop.permute.xlu1 %1176 }
 0x2af   : > { %v1179_v47 = vsel %vm593_vm2, %v1177_v46, 0.0 }
 0x2b0   : > { %1180 = vadd.xlane.f32.xlu1 %v1179_v47 }
 0x2b2   : > { %v812_v49 = vpop.permute.xlu1 %811 }
 0x2b6   : > { %v799_v50 = vpop.permute.xlu1 %798 }
 0x2ba   : > { %v993_v52 = vpop.permute.xlu1 %992 }
 0x2c1   : > { %1185 = vrot.lane.b32.xlu1 %v2483_v33, %s2250_s20 }
 0x2c2   : > { %1198 = vrot.lane.b32.xlu0 %v1883_v27, %s2248_s16 }
 0x2e1   : > { %595 = vadd.xlane.f32.xlu0 %v594_v48 }
 0x325   : > { %v613_v54 = vpop.xlane.xlu1 %612 }
 0x326   : > { %v614_v55 = vmax.f32 %v613_v54, 1e-24 }
 0x328   : > { %2115 = vrsqrt.f32 %v614_v55 }
 0x329   : > { %v807_v56 = vpop.xlane.xlu0 %806  ;;  %v794_v57 = vpop.xlane.xlu1 %793 }
 0x32a   : > { %v808_v58 = vmax.f32 %v807_v56, 1e-24  ;;  %v795_v59 = vmax.f32 %v794_v57, 1e-24 }
 0x32c   : > { %2117 = vrsqrt.f32 %v808_v58 }
 0x32d   : > { %2119 = vrsqrt.f32 %v795_v59  ;;  %v1001_v60 = vpop.xlane.xlu0 %1000 }
 0x32e   : > { %v1002_v61 = vmax.f32 %v1001_v60, 1e-24 }
 0x330   : > { %2121 = vrsqrt.f32 %v1002_v61 }
 0x331   : > { %v988_v62 = vpop.xlane.xlu1 %987 }
 0x332   : > { %v989_v63 = vmax.f32 %v988_v62, 1e-24 }
 0x334   : > { %2123 = vrsqrt.f32 %v989_v63 }
 0x335   : > { %v2116_v0 = vpop.eup %2115  ;;  %v1194_v2 = vpop.xlane.xlu0 %1193 }
 0x336   : > { %v1195_v3 = vmax.f32 %v1194_v2, 1e-24  ;;  %v616_v4 = vmul.f32 %v2116_v0, %v2455_v24 }
 0x338   : > { %2125 = vrsqrt.f32 %v1195_v3  ;;  %v625_v5 = vmul.f32 %v623_v51, %v616_v4 }
 0x339   : > { %v2118_v6 = vpop.eup %2117  ;;  %v1181_v7 = vpop.xlane.xlu1 %1180 }
 0x33a   : > { %v2120_v8 = vpop.eup %2119  ;;  %v1182_v9 = vmax.f32 %v1181_v7, 1e-24  ;;  %627 = vrot.lane.b32.xlu1 %v625_v5, %s2249_s18  ;;  %v810_v10 = vmul.f32 %v2118_v6, %v2455_v24  ;;  %v1199_v25 = vpop.permute.xlu0 %1198 }
 0x33b   : > { %v797_v13 = vmul.f32 %v2120_v8, %v2455_v24 }
 0x33c   : > { %2127 = vrsqrt.f32 %v1182_v9  ;;  %v814_v11 = vmul.f32 %v812_v49, %v810_v10 }
 0x33d   : > { %v2122_v14 = vpop.eup %2121  ;;  %v801_v15 = vmul.f32 %v799_v50, %v797_v13  ;;  %v1186_v29 = vpop.permute.xlu1 %1185 }
 0x33e   : > { %819 = vrot.lane.b32.xlu1 %v814_v11, %s2250_s20  ;;  %v1004_v16 = vmul.f32 %v2122_v14, %v2455_v24 }
 0x340   : > { %v1008_v18 = vmul.f32 %v1006_v53, %v1004_v16 }
 0x341   : > { %v2124_v17 = vpop.eup %2123 }
 0x342   : > { %816 = vrot.lane.b32.xlu1 %v801_v15, %s2248_s16  ;;  %v991_v19 = vmul.f32 %v2124_v17, %v2455_v24 }
 0x344   : > { %v995_v22 = vmul.f32 %v993_v52, %v991_v19 }
 0x345   : > { %v2126_v20 = vpop.eup %2125 }
 0x346   : > { %1013 = vrot.lane.b32.xlu1 %v1008_v18, %s2251_s14  ;;  %v1197_v21 = vmul.f32 %v2126_v20, %v2455_v24 }
 0x348   : > { %v1201_v27 = vmul.f32 %v1199_v25, %v1197_v21 }
 0x349   : > { %v2128_v23 = vpop.eup %2127 }
 0x34a   : > { %1010 = vrot.lane.b32.xlu1 %v995_v22, %s2252_s25  ;;  %v1184_v28 = vmul.f32 %v2128_v23, %v2455_v24 }
 0x34c   : > { %v1188_v30 = vmul.f32 %v1186_v29, %v1184_v28  ;;  %v1392_v28 = vld [vmem:[%s2413_s23 + $0x38] sm:$0xff]  ;;  %v1391_v29 = vld [vmem:[%s2413_s23 + $0x30] sm:$0xff] }
 0x34e   : > { %1206 = vrot.lane.b32.xlu1 %v1201_v27, %s2253_s30 }
 0x352   : > { %1203 = vrot.lane.b32.xlu1 %v1188_v30, %s2254_s15  ;;  %v1390_v30 = vld [vmem:[%s2413_s23 + $0x28] sm:$0xff] }
 0x36a   : > { %v596_v31 = vpop.xlane.xlu0 %595 }
 0x36b   : > { %v597_v32 = vmax.f32 %v596_v31, 1e-24 }
 0x36d   : > { %2129 = vrsqrt.f32 %v597_v32  ;;  %v1389_v32 = vld [vmem:[%s2413_s23 + $0x20] sm:$0xff] }
 0x37a   : > { %v2130_v34 = vpop.eup %2129 }
 0x37b   : > { %v599_v35 = vmul.f32 %v2130_v34, %v2455_v24  ;;  %v1388_v34 = vld [vmem:[%s2413_s23 + $0x18] sm:$0xff] }
 0x37d   : > { %v606_v37 = vmul.f32 %v2483_v33, %v599_v35 }
 0x3ac   : > { %v628_v36 = vpop.permute.xlu1 %627 }
 0x3ad   : > { %1947 = vmatpush3.xpose.msk.msra.mxu0 %vm593_vm2, %v628_v36  ;;  %v1387_v36 = vld [vmem:[%s2413_s23 + $0x10] sm:$0xff] }
 0x3ae   : > { %1956 = vmatprep.subr.mxu0 %v2247_v12 }
 0x3b0   : > { %v820_v38 = vpop.permute.xlu1 %819  ;;  %1949 = vmatmul.mubr.msk.f32.vlgmr.msra.gmra.mxu0 %vm593_vm2, %v606_v37 }
 0x3b1   : > { %1957 = vmatpush3.xpose.msk.msra.mxu0 %vm593_vm2, %v820_v38  ;;  %1958 = vmatprep.mubr.msk.f32.mxu0 %vm2255_vm3, %v2247_v12  ;;  %v1386_v38 = vld [vmem:[%s2413_s23 + $0x8] sm:$0xff] }
 0x3b2   : > { %1966 = vmatprep.subr.mxu0 %v2247_v12 }
 0x3b4   : > { %v817_v39 = vpop.permute.xlu1 %816 }
 0x3b5   : > { %1959 = vmatmul.mubr.msk.f32.vlgmr.msra.gmra.mxu0 %vm593_vm2, %v817_v39 }
 0x3b6   : > { %1968 = vmatprep.mubr.msk.f32.mxu0 %vm2255_vm3, %v2247_v12 }
 0x3b8   : > { %v1014_v24 = vpop.permute.xlu1 %1013 }
 0x3b9   : > { %1967 = vmatpush3.xpose.msk.msra.mxu0 %vm593_vm2, %v1014_v24  ;;  %v1385_v24 = vld [vmem:[%s2413_s23] sm:$0xff] }
 0x3ba   : > { %1976 = vmatprep.subr.mxu0 %v2247_v12 }
 0x3bc   : > { %v1011_v33 = vpop.permute.xlu1 %1010 }
 0x3bd   : > { %1969 = vmatmul.mubr.msk.f32.vlgmr.msra.gmra.mxu0 %vm593_vm2, %v1011_v33 }
 0x3be   : > { %1978 = vmatprep.mubr.msk.f32.mxu0 %vm2255_vm3, %v2247_v12 }
 0x3c0   : > { %v1207_v40 = vpop.permute.xlu1 %1206 }
 0x3c1   : > { %1977 = vmatpush3.xpose.msk.msra.mxu0 %vm593_vm2, %v1207_v40 }
 0x3c2   : > { %1986 = vmatprep.subr.mxu0 %v2247_v12 }
 0x3c4   : > { %v1204_v41 = vpop.permute.xlu1 %1203 }
 0x3c5   : > { %1979 = vmatmul.mubr.msk.f32.vlgmr.msra.gmra.mxu0 %vm593_vm2, %v1204_v41 }
 0x3c6   : > { %2002 = vmatprep.mubr.msk.f32.mxu0 %vm2255_vm3, %v2247_v12  ;;  %1987 = vmatpush3.msra.mxu0 %v1392_v28 }
 0x3c7   : > { %1988 = vmatprep.subr.mxu0 %v2247_v12 }
 0x3c8   : > { %1989 = vmatpush3.msra.mxu0 %v1391_v29 }
 0x3c9   : > { %1990 = vmatprep.subr.mxu0 %v2247_v12 }
 0x3ca   : > { %1991 = vmatpush3.msra.mxu0 %v1390_v30 }
 0x3cb   : > { %1992 = vmatprep.subr.mxu0 %v2247_v12 }
 0x3cc   : > { %1993 = vmatpush3.msra.mxu0 %v1389_v32 }
 0x3cd   : > { %1994 = vmatprep.subr.mxu0 %v2247_v12 }
 0x3ce   : > { %1995 = vmatpush3.msra.mxu0 %v1388_v34 }
 0x3cf   : > { %1996 = vmatprep.subr.mxu0 %v2247_v12 }
 0x3d0   : > { %1997 = vmatpush3.msra.mxu0 %v1387_v36  ;;  %v1595_v36 = vld [vmem:[%s2428_s9] sm:$0xff] }
 0x3d1   : > { %1998 = vmatprep.subr.mxu0 %v2247_v12 }
 0x3d2   : > { %1999 = vmatpush3.msra.mxu0 %v1386_v38 }
 0x3d3   : > { %2000 = vmatprep.subr.mxu0 %v2247_v12 }
 0x3d4   : > { %2001 = vmatpush3.msra.mxu0 %v1385_v24 }
 0x470   : > { %v700_v42 = vpop.f32.mrf.mxu0 }
 0x471   : > { %v705_v43 = vsel %vm704_vm4, %v700_v42, -inf }
 0x472   : > { %706 = vmax.xlane.f32.xlu1 %v705_v43  ;;  %v1950_v44 = vpop.f32.mrf.mxu0 }
 0x475   : > { %v891_v45 = vpop.f32.mrf.mxu0 }
 0x476   : > { %v895_v46 = vsel %vm704_vm4, %v891_v45, -inf }
 0x477   : > { %896 = vmax.xlane.f32.xlu0 %v895_v46  ;;  %v1960_v47 = vpop.f32.mrf.mxu0 }
 0x47d   : > { %v1085_v48 = vpop.f32.mrf.mxu0 }
 0x47e   : > { %v1089_v49 = vsel %vm704_vm4, %v1085_v48, -inf }
 0x47f   : > { %1090 = vmax.xlane.f32.xlu0 %v1089_v49  ;;  %v1970_v50 = vpop.f32.mrf.mxu0 }
 0x483   : > { %1100 = vrot.lane.b32.xlu1 %v2459_v26, %s2252_s25 }
 0x485   : > { %v1278_v51 = vpop.f32.mrf.mxu0 }
 0x486   : > { %v1282_v52 = vsel %vm704_vm4, %v1278_v51, -inf }
 0x487   : > { %1283 = vmax.xlane.f32.xlu0 %v1282_v52  ;;  %v1980_v53 = vpop.f32.mrf.mxu0 }
 0x49d   : > { %907 = vrot.lane.b32.xlu0 %v2459_v26, %s2248_s16 }
 0x4fb   : > { %v707_v54 = vpop.xlane.xlu1 %706 }
 0x4fc   : > { %v708_v55 = vsub.f32 %v700_v42, %v707_v54 }
 0x4fe   : > { %v709_v56 = vmul.f32 1.442695, %v708_v55 }
 0x4ff   : > { %v1101_v20 = vpop.permute.xlu1 %1100 }
 0x500   : > { %2131 = vpow2.f32 %v709_v56  ;;  %v897_v57 = vpop.xlane.xlu0 %896 }
 0x501   : > { %v898_v58 = vsub.f32 %v891_v45, %v897_v57 }
 0x503   : > { %v899_v59 = vmul.f32 1.442695, %v898_v58  ;;  %v1496_v58 = vld [vmem:[%s2422_s11 + $0x38] sm:$0xff] }
 0x505   : > { %2133 = vpow2.f32 %v899_v59  ;;  %v1494_v59 = vld [vmem:[%s2422_s11 + $0x28] sm:$0xff] }
 0x508   : > { %v1091_v60 = vpop.xlane.xlu0 %1090 }
 0x509   : > { %v1092_v61 = vsub.f32 %v1085_v48, %v1091_v60  ;;  %v1493_v60 = vld [vmem:[%s2422_s11 + $0x20] sm:$0xff] }
 0x50b   : > { %v1093_v62 = vmul.f32 1.442695, %v1092_v61  ;;  %v1492_v61 = vld [vmem:[%s2422_s11 + $0x18] sm:$0xff] }
 0x50d   : > { %v2132_v63 = vpop.eup %2131  ;;  %2135 = vpow2.f32 %v1093_v62  ;;  %v1491_v62 = vld [vmem:[%s2422_s11 + $0x10] sm:$0xff] }
 0x50e   : > { %v711_v0 = vsel %vm704_vm4, %v2132_v63, 0.0 }
 0x50f   : > { %712 = vadd.xlane.f32.xlu0 %v711_v0  ;;  %v1489_v0 = vld [vmem:[%s2422_s11] sm:$0xff] }
 0x510   : > { %v1284_v2 = vpop.xlane.xlu0 %1283 }
 0x511   : > { %v1285_v3 = vsub.f32 %v1278_v51, %v1284_v2 }
 0x512   : > { %v2134_v4 = vpop.eup %2133 }
 0x513   : > { %v1286_v5 = vmul.f32 1.442695, %v1285_v3  ;;  %v901_v6 = vsel %vm704_vm4, %v2134_v4, 0.0 }
 0x514   : > { %902 = vadd.xlane.f32.xlu0 %v901_v6  ;;  %v908_v11 = vpop.permute.xlu0 %907  ;;  %v1897_v6 = vld [vmem:[%s465_s26] ss:$0 sm:$0xff]  ;;  %s2257_s26 = smov 43  }
 0x515   : > { %2137 = vpow2.f32 %v1286_v5 }
 0x51a   : > { %v2136_v7 = vpop.eup %2135 }
 0x51b   : > { %v1095_v8 = vsel %vm704_vm4, %v2136_v7, 0.0 }
 0x51c   : > { %1096 = vadd.xlane.f32.xlu0 %v1095_v8 }
 0x522   : > { %v2138_v9 = vpop.eup %2137 }
 0x523   : > { %v1288_v10 = vsel %vm704_vm4, %v2138_v9, 0.0 }
 0x524   : > { %1289 = vadd.xlane.f32.xlu0 %v1288_v10  ;;  %v1604_v10 = vld [vmem:[%s2428_s9 + $0x48] sm:$0xff] }
 0x53a   : > { %1293 = vrot.lane.b32.xlu0 %v2459_v26, %s2254_s15 }
 0x598   : > { %v713_v13 = vpop.xlane.xlu0 %712 }
 0x599   : > { %2139 = vrcp.f32 %v713_v13  ;;  %v1602_v13 = vld [vmem:[%s2428_s9 + $0x38] sm:$0xff] }
 0x59d   : > { %v903_v14 = vpop.xlane.xlu0 %902 }
 0x59e   : > { %2141 = vrcp.f32 %v903_v14  ;;  %v1601_v14 = vld [vmem:[%s2428_s9 + $0x30] sm:$0xff] }
 0x5a5   : > { %v1097_v15 = vpop.xlane.xlu0 %1096 }
 0x5a6   : > { %v2140_v16 = vpop.eup %2139  ;;  %2143 = vrcp.f32 %v1097_v15  ;;  %v1600_v15 = vld [vmem:[%s2428_s9 + $0x28] sm:$0xff] }
 0x5a7   : > { %v715_v17 = vmul.f32 %v2140_v16, %v2132_v63  ;;  %v1490_v63 = vld [vmem:[%s2422_s11 + $0x8] sm:$0xff] }
 0x5a9   : > { %1954 = vmatmul.mubr.msk.f32.vlgmr.msra.gmra.mxu1 %vm704_vm4, %v715_v17  ;;  %v1599_v17 = vld [vmem:[%s2428_s9 + $0x20] sm:$0xff] }
 0x5aa   : > { %1962 = vmatpush3.msra.mxu1 %v908_v11  ;;  %1963 = vmatprep.mubr.msk.f32.mxu1 %vm2255_vm3, %v2247_v12  ;;  %v1603_v11 = vld [vmem:[%s2428_s9 + $0x40] sm:$0xff] }
 0x5ab   : > { %v2142_v18 = vpop.eup %2141  ;;  %1971 = vmatprep.subr.mxu1 %v2247_v12 }
 0x5ac   : > { %v905_v19 = vmul.f32 %v2142_v18, %v2134_v4  ;;  %v1598_v18 = vld [vmem:[%s2428_s9 + $0x18] sm:$0xff] }
 0x5ad   : > { %v1290_v26 = vpop.xlane.xlu0 %1289 }
 0x5ae   : > { %2145 = vrcp.f32 %v1290_v26  ;;  %1964 = vmatmul.mubr.msk.f32.vlgmr.msra.gmra.mxu1 %vm704_vm4, %v905_v19  ;;  %v1597_v19 = vld [vmem:[%s2428_s9 + $0x10] sm:$0xff]  ;;  %v1596_v26 = vld [vmem:[%s2428_s9 + $0x8] sm:$0xff] }
 0x5af   : > { %1972 = vmatpush3.msra.mxu1 %v1101_v20  ;;  %1973 = vmatprep.mubr.msk.f32.mxu1 %vm2255_vm3, %v2247_v12 }
 0x5b0   : > { %1981 = vmatprep.subr.mxu1 %v2247_v12 }
 0x5b1   : > { %v1294_v23 = vpop.permute.xlu0 %1293 }
 0x5b3   : > { %v2144_v21 = vpop.eup %2143 }
 0x5b4   : > { %v1099_v22 = vmul.f32 %v2144_v21, %v2136_v7 }
 0x5b6   : > { %1974 = vmatmul.mubr.msk.f32.vlgmr.msra.gmra.mxu1 %vm704_vm4, %v1099_v22 }
 0x5b7   : > { %1982 = vmatpush3.msra.mxu1 %v1294_v23  ;;  %1983 = vmatprep.mubr.msk.f32.mxu1 %vm2255_vm3, %v2247_v12 }
 0x5b8   : > { %1524 = vmatprep.subr.mxu1 %v1496_v58 }
 0x5bb   : > { %v2146_v25 = vpop.eup %2145 }
 0x5bc   : > { %v1292_v27 = vmul.f32 %v2146_v25, %v2138_v9  ;;  %v1605_v9 = vld [vmem:[%s2428_s9 + $0x50] sm:$0x1f] }
 0x5be   : > { %1984 = vmatmul.mubr.msk.f32.vlgmr.msra.gmra.mxu1 %vm704_vm4, %v1292_v27 }
 0x5bf   : > { %1564 = vmatprep.mubr.f32.mxu1 %v2247_v12 }
 0x669   : > { %v785_v31 = vpop.f32.mrf.mxu1 }
 0x66b   : > { %v1955_v35 = vpop.f32.mrf.mxu1 }
 0x66e   : > { %v979_v37 = vpop.f32.mrf.mxu1 }
 0x66f   : > { %1370 = vrot.lane.b32.xlu1 %v979_v37, %s2253_s30 }
 0x670   : > { %v1965_v39 = vpop.f32.mrf.mxu1 }
 0x676   : > { %v1172_v33 = vpop.f32.mrf.mxu1 }
 0x677   : > { %1374 = vrot.lane.b32.xlu0 %v1172_v33, %s2251_s14 }
 0x678   : > { %v1975_v40 = vpop.f32.mrf.mxu1 }
 0x67e   : > { %v1365_v41 = vpop.f32.mrf.mxu1 }
 0x67f   : > { %1378 = vrot.lane.b32.xlu1 %v1365_v41, %s2250_s20 }
 0x680   : > { %v1985_v42 = vpop.f32.mrf.mxu1 }
 0x6e1   : > { %v1371_v43 = vpop.permute.xlu1 %1370 }
 0x6e2   : > { %v1381_v45 = vsel %vm593_vm2, %v785_v31, %v1371_v43 }
 0x6e9   : > { %v1375_v44 = vpop.permute.xlu0 %1374 }
 0x6ea   : > { %v1382_v46 = vsel %vm485_vm1, %v1381_v45, %v1375_v44 }
 0x6f1   : > { %v1379_v47 = vpop.permute.xlu1 %1378 }
 0x6f2   : > { %v1384_v48 = vsel %vm1383_vm5, %v1382_v46, %v1379_v47 }
 0x6f3   : > { %2003 = vmatmul.mubr.msk.f32.vlgmr.msra.gmra.mxu0 %vm1393_vm6, %v1384_v48 }
 0x7b3   : > { %v1463_v49 = vpop.f32.mrf.mxu0 }
 0x7b4   : > { %v2588_v50 = vadd.f32 %v1463_v49, %v2432_v1  ;;  %v1495_v1 = vld [vmem:[%s2422_s11 + $0x30] sm:$0xff]  ;;  %s2256_s11 = smov 85  }
 0x7b5   : > { %v2004_v51 = vpop.f32.mrf.mxu0  ;;  %1525 = vmatpush1.msra.mxu1 %v1495_v1 }
 0x7b6   : > { %v1469_v52 = vsel %vm485_vm1, %v2588_v50, 0.0  ;;  %1526 = vmatprep.subr.mxu1 %v1494_v59 }
 0x7b7   : > { %1470 = vadd.xlane.f32.xlu0 %v1469_v52  ;;  %1527 = vmatpush1.msra.mxu1 %v1493_v60 }
 0x7b8   : > { %1528 = vmatprep.subr.mxu1 %v1492_v61 }
 0x7b9   : > { %1529 = vmatpush1.msra.mxu1 %v1491_v62 }
 0x7ba   : > { %1530 = vmatprep.subr.mxu1 %v1490_v63 }
 0x7bb   : > { %1531 = vmatpush1.msra.mxu1 %v1489_v0 }
 0x7bc   : > { %2005 = vmatprep.subr.mxu1 %v2247_v12 }
 0x840   : > { %v1471_v53 = vpop.xlane.xlu0 %1470 }
 0x841   : > { %v1472_v54 = vmul.f32 0.03125, %v1471_v53 }
 0x843   : > { %v1473_v55 = vsub.f32 %v2588_v50, %v1472_v54 }
 0x845   : > { %v1474_v56 = vmul.f32 %v1473_v55, %v1473_v55 }
 0x847   : > { %v1475_v57 = vsel %vm485_vm1, %v1474_v56, 0.0 }
 0x848   : > { %1476 = vadd.xlane.f32.xlu1 %v1475_v57 }
 0x8d1   : > { %v1477_v2 = vpop.xlane.xlu1 %1476 }
 0x8d2   : > { %v1478_v3 = vmul.f32 0.03125, %v1477_v2 }
 0x8d4   : > { %v1479_v4 = vadd.f32 1e-05, %v1478_v3 }
 0x8d6   : > { %2147 = vrsqrt.f32 %v1479_v4 }
 0x8e3   : > { %v2148_v5 = vpop.eup %2147 }
 0x8e4   : > { %v1481_v7 = vmul.f32 %v2148_v5, %v1473_v55 }
 0x8e6   : > { %v1488_v8 = vmul.f32 %v1897_v6, %v1481_v7 }
 0x8e8   : > { %1898 = vmatmul.mubr.msk.f32.vlgmr.msra.gmra.mxu1 %vm485_vm1, %v1488_v8 }
 0x8e9   : > { %2027 = vmatprep.mubr.msk.f32.mxu1 %vm2255_vm3, %v2247_v12  ;;  %2006 = vmatpush3.msk.msra.mxu1 %vm1617_vm7, %v1605_v9 }
 0x8ea   : > { %2007 = vmatprep.subr.mxu1 %v2247_v12 }
 0x8eb   : > { %2008 = vmatpush3.msra.mxu1 %v1604_v10 }
 0x8ec   : > { %2009 = vmatprep.subr.mxu1 %v2247_v12 }
 0x8ed   : > { %2010 = vmatpush3.msra.mxu1 %v1603_v11 }
 0x8ee   : > { %2011 = vmatprep.subr.mxu1 %v2247_v12 }
 0x8ef   : > { %2012 = vmatpush3.msra.mxu1 %v1602_v13 }
 0x8f0   : > { %2013 = vmatprep.subr.mxu1 %v2247_v12 }
 0x8f1   : > { %2014 = vmatpush3.msra.mxu1 %v1601_v14 }
 0x8f2   : > { %2015 = vmatprep.subr.mxu1 %v2247_v12 }
 0x8f3   : > { %2016 = vmatpush3.msra.mxu1 %v1600_v15 }
 0x8f4   : > { %2017 = vmatprep.subr.mxu1 %v2247_v12 }
 0x8f5   : > { %2018 = vmatpush3.msra.mxu1 %v1599_v17 }
 0x8f6   : > { %2019 = vmatprep.subr.mxu1 %v2247_v12 }
 0x8f7   : > { %2020 = vmatpush3.msra.mxu1 %v1598_v18 }
 0x8f8   : > { %2021 = vmatprep.subr.mxu1 %v2247_v12 }
 0x8f9   : > { %2022 = vmatpush3.msra.mxu1 %v1597_v19 }
 0x8fa   : > { %2023 = vmatprep.subr.mxu1 %v2247_v12 }
 0x8fb   : > { %2024 = vmatpush3.msra.mxu1 %v1596_v26 }
 0x8fc   : > { %2025 = vmatprep.subr.mxu1 %v2247_v12 }
 0x8fd   : > { %2026 = vmatpush3.msra.mxu1 %v1595_v36 }
 0x9a8   : > { %v1566_v16 = vpop.f32.mrf.mxu1 }
 0x9a9   : > { %1590 = vrot.lane.b32.xlu0 %v1566_v16, %s2256_s11  ;;  %v1571_v21 = vmul.f32 %v1566_v16, %v1566_v16 }
 0x9aa   : > { %v1568_v20 = vpop.f32.mrf.mxu1 }
 0x9ab   : > { %v1572_v22 = vmul.f32 %v1568_v20, %v1568_v20  ;;  %v1573_v23 = vmul.f32 %v1571_v21, %v1566_v16 }
 0x9ad   : > { %v1574_v25 = vmul.f32 %v1572_v22, %v1568_v20  ;;  %v1575_v27 = vmul.f32 0.044715, %v1573_v23 }
 0x9af   : > { %v1576_v28 = vmul.f32 0.044715, %v1574_v25  ;;  %v1577_v29 = vadd.f32 %v1575_v27, %v1566_v16 }
 0x9b1   : > { %v1578_v30 = vadd.f32 %v1576_v28, %v1568_v20  ;;  %v1579_v31 = vmul.f32 0.7978846, %v1577_v29 }
 0x9b3   : > { %v1580_v32 = vmul.f32 0.7978846, %v1578_v30  ;;  %2149 = vtanh.f32 %v1579_v31 }
 0x9b5   : > { %2151 = vtanh.f32 %v1580_v32 }
 0x9c0   : > { %v2150_v34 = vpop.eup %2149 }
 0x9c1   : > { %v1583_v37 = vadd.f32 1.0, %v2150_v34 }
 0x9c2   : > { %v2152_v35 = vpop.eup %2151 }
 0x9c3   : > { %v1584_v38 = vadd.f32 1.0, %v2152_v35  ;;  %v1585_v12 = vmul.f32 0.5, %v1583_v37 }
 0x9c5   : > { %v1586_v39 = vmul.f32 0.5, %v1584_v38  ;;  %v1587_v24 = vmul.f32 %v1585_v12, %v1566_v16 }
 0x9c7   : > { %v1588_v33 = vmul.f32 %v1586_v39, %v1568_v20 }
 0xa1b   : > { %v1591_v40 = vpop.permute.xlu0 %1590 }
 0xa1c   : > { %v1593_v41 = vmul.f32 %v1591_v40, %v1587_v24  ;;  %v1594_v42 = vmul.f32 %v1591_v40, %v1588_v33 }
 0xa1e   : > { %1608 = vrot.lane.b32.xlu1 %v1593_v41, %s2257_s26  ;;  %1610 = vrot.lane.b32.xlu0 %v1594_v42, %s2257_s26 }
 0xa90   : > { %v1609_v43 = vpop.permute.xlu1 %1608  ;;  %v1611_v44 = vpop.permute.xlu0 %1610 }
 0xa91   : > { %v1613_v45 = vsel %vm1612_vm8, %v1609_v43, %v1611_v44 }
 0xa92   : > { %2028 = vmatmul.mubr.msk.f32.vlgmr.msra.gmra.mxu1 %vm1614_vm9, %v1613_v45 }
 0xb51   : > { %1696 = sbr.rel (%p1901_p1) target bundleno = 2903 (0xb57), region = 64 }
 0xb52   : > { %v1687_v46 = vpop.f32.mrf.mxu1 }
 0xb53   : > { %v1691_v47 = vadd.f32 %v1687_v46, %v2588_v50 }
 0xb54   : > { %v2029_v48 = vpop.f32.mrf.mxu1 }
 0xb55   : > { %1692 = vst.msk [vmem:[#allocation2] sm:$0xff] %vm485_vm1, %v1691_v47 }
 0xb56   : > { %1697 = vst.msk [vmem:[%s439_s28] sm:$0xff] %vm485_vm1, %v1691_v47 }
 0xb57 PF: > { %s1903_s9 = sshll.u32 %s2233_s13, 7  ;;  %s2726_s17 = sld [smem:[#allocation17_spill]] }
 0xb58   : > { %s1712_s20 = sshll.u32 %s439_s28, 4  ;;  %s2727_s14 = sand.u32 1, %s2221_s10   ;;  %s1713_s20 = int_to_ptr.vmem [resolvable:$true] %s1712_s20 }
 0xb59   : > { %s1699_s12 = scalar_lea.sflag [#allocation4], %s2727_s14  ;;  %s2153_s25 = scalar_lea.vmem %s1713_s20, 128 }
 0xb5a   : > { %p2154_p2 = scmp.ne.s32.totalorder %s1713_s20, %s2153_s25  ;;  %s2258_s30 = smov [#allocation3]  }
 0xb5b   : > { %s2157_s22 = sshll.u32 %s2258_s30, 4  ;;  %s2158_s22 = int_to_ptr.vmem [resolvable:$false] %s2157_s22 }
 0xb5c   : > { %p2155_p4 = pnand %p2154_p2, %p2358_p3  ;;  %s2159_s21 = scalar_lea.vmem %s2158_s22, 256 }
 0xb5d   : > { %s1710_s19 = scalar_lea.hbm %s2726_s17, %s1903_s9  ;;  %p2160_p6 = scmp.lt.s32.totalorder %s1713_s20, %s2158_s22 }
 0xb5e   : > { %p2156_p5 = pneg %p2155_p4  ;;  %p2161_p7 = scmp.lt.s32.totalorder %s2159_s21, %s2153_s25 }
 0xb60   : > { %p2162_p8 = por %p2161_p7, %p2160_p6 }
 0xb62   : > { %p2163_p10 = pnand %p2162_p8, %p2156_p5 }
 0xb64   : > { %2166 = shalt.err (!%p2163_p10)
}
 0xb65   : > { %s2167_s13 = scalar_lea.hbm %s1710_s19, 128  ;;  %s2171_s0 = scalar_lea.hbm %s2726_s17, 256 }
 0xb66   : > { %p2168_p11 = scmp.ne.s32.totalorder %s1710_s19, %s2167_s13  ;;  %p2172_p0 = scmp.lt.s32.totalorder %s1710_s19, %s2726_s17 }
 0xb67   : > { %p2173_p1 = scmp.lt.s32.totalorder %s2171_s0, %s2167_s13 }
 0xb68   : > { %p2169_p12 = pnand %p2168_p11, %p2358_p3 }
 0xb69   : > { %p2174_p2 = por %p2173_p1, %p2172_p0 }
 0xb6a   : > { %p2170_p13 = pneg %p2169_p12 }
 0xb6c   : > { %p2175_p4 = pnand %p2174_p2, %p2170_p13 }
 0xb6e   : > { %2178 = shalt.err (!%p2175_p4)
}
 0xb6f   : > { %2031 = dma.vmem_to_hbm [thread:$0]  (%p2358_p3), %s1713_s20, 128, %s1710_s19, %s1699_s12  }
 0xb70 PF: > { %s2728_s24 = sld [smem:[#allocation10_spill]] }
 0xb71   : > { %s2729_s11 = sld [smem:[#allocation6_spill]] }
 0xb76   : > { %p2037_p5 = scmp.ge.s32.totalorder %s2728_s24, 2 }
 0xb77   : > { %s1724_s9 = sand.u32 1, %s2729_s11  }
 0xb78   : > { %p2034_p6 = pnand %p2037_p5, %p2368_p9  ;;  %s1725_s16 = scalar_lea.sflag [#allocation4], %s1724_s9 }
 0xb7a   : > { %p2035_p7 = pneg %p2034_p6 }
 0xb7c   : > { %2212 = dma.done.wait (%p2035_p7), %s1725_s16, 128  }
 0xb7d   : > { %2214 = vsyncadd (%p2035_p7), %s1725_s16, 4294967168  ;;  %s22_s16 = sadd.s32 1, %s2728_s24   ;;  %s2731_s18 = sld [smem:[#allocation7_spill]] }
 0xb7e   : > { %p19_p8 = scmp.ge.s32.totalorder %s22_s16, 6   ;;  %s2732_s11 = sld [smem:[#allocation15_spill]] }
 0xb7f   : > { %s2733_s12 = sld [smem:[#allocation8_spill]]  ;;  %s2737_s30 = smov %s2221_s10 }
 0xb80   : > { %s2734_s13 = sld [smem:[#allocation9_spill]]  ;;  %21 = sbr.rel (!%p19_p8) target bundleno = 8 (0x8), region = 123 }
 0xb81   : > { %s2735_s14 = sld [smem:[#allocation11_spill]] }
 0xb82   : > { %s2736_s15 = sld [smem:[#allocation13_spill]] }
 0xb83   : > { %s2738_s10 = smov %s2731_s18 }
 0xb85   :  { %1730 = vsyncpa [#allocation4], 1 }
 0xb86   :  { %1732 = vsyncpa [#allocation4 + $0x1], 1 }

</bundles_post_ra>
